<compile_context>
chip_gen: v7x
topology: tpu7x:2x2x1
jax: 0.10.0
libtpu: 0.0.40
codegen_flags: <defaults>
</compile_context>

<pallas_src>
import numpy as np
import jax
import jax.numpy as jnp
from jax.experimental import pallas as pl
from jax.experimental.pallas import tpu as pltpu


# ---------------------------------------------------------------------------
# Model configuration (small, consistent with the module's forward pass).
# ---------------------------------------------------------------------------
B = 2        # batch
T = 16       # sequence length
H = 32       # hidden_dim
OUT = 32     # out_dim (== hidden_dim so the residual add is well-formed)
K = 3        # conv kernel size (padding = 1 -> "same")

assert OUT == H, "residual add requires out_dim == hidden_dim"

# Packed-parameter row offsets inside the single weight buffer.
_W1_OFF = 0
_W2_OFF = K * H
_FC_OFF = 2 * K * H


def _mish(x):
    # mish(x) = x * tanh(softplus(x)).  Single-exp rewrite:
    #   tanh(softplus(x)) = u / (u + 2),  u = t*(t+2),  t = exp(x).
    # Clamp before exp so the unselected where-branch stays finite (no NaN
    # can leak into later reductions); exact divide keeps ~1e-6 agreement.
    xs = jnp.minimum(x, 20.0)
    t = jnp.exp(xs)
    u = t * (t + 2.0)
    y = x * u / (u + 2.0)
    # For x > 20, tanh(softplus(x)) == 1 in f32.
    return jnp.where(x > 20.0, x, y)


# ---------------------------------------------------------------------------
# Pallas kernel: whole batch in one invocation, everything resident in VMEM.
# ---------------------------------------------------------------------------
def prenet_kernel(x_ref, w_ref, b_ref, out_ref):
    # x_ref   : (B*T, H)            input, batch folded into sublanes
    # w_ref   : (2*K*H + H, H)      [w1 taps | w2 taps | fc],  all (in -> out)
    # b_ref   : (3, H)              [b1 ; b2 ; fcb]
    # out_ref : (B*T, OUT)

    x = x_ref[...]                                        # (B*T, H)

    # Boundary masks (compile-time iota; hoisted, shared by both convs).
    # Row r = b*T + t.  Tap reading t-1 is invalid at t == 0 (per batch);
    # tap reading t+1 is invalid at t == T-1.
    row = jax.lax.broadcasted_iota(jnp.int32, (B * T, H), 0)
    tpos = row % T
    prev_ok = tpos != 0            # valid rows for the t-1 tap
    next_ok = tpos != (T - 1)      # valid rows for the t+1 tap

    def conv_mish(h, w_off, b_row):
        # shift(+1): row t sees h[t-1];  shift(-1): row t sees h[t+1].
        # Wrap-around / cross-batch rows are zeroed by the masks (== the
        # Conv1d zero padding).
        h_m1 = jnp.where(prev_ok, pltpu.roll(h, shift=1, axis=0), 0.0)
        h_p1 = jnp.where(next_ok, pltpu.roll(h, shift=B * T - 1, axis=0), 0.0)
        acc = jnp.dot(h_m1, w_ref[w_off:w_off + H, :],
                      preferred_element_type=jnp.float32)
        acc = acc + jnp.dot(h, w_ref[w_off + H:w_off + 2 * H, :],
                            preferred_element_type=jnp.float32)
        acc = acc + jnp.dot(h_p1, w_ref[w_off + 2 * H:w_off + 3 * H, :],
                            preferred_element_type=jnp.float32)
        acc = acc + b_ref[b_row:b_row + 1, :]
        return _mish(acc)

    # ---- Conv1d #1 + Mish (dropout = identity in eval) ----
    h1 = conv_mish(x, _W1_OFF, 0)
    # ---- Conv1d #2 + Mish (operands stay in vregs; no VMEM round-trip) ----
    h2 = conv_mish(h1, _W2_OFF, 1)
    # ---- Linear + residual ----
    y = jnp.dot(h2, w_ref[_FC_OFF:_FC_OFF + H, :],
                preferred_element_type=jnp.float32)
    out_ref[...] = (y + b_ref[2:3, :] + x).astype(out_ref.dtype)


def prenet_pallas(x, params):
    """x: [B, T, H] float32 -> [B, T, OUT] float32."""
    w_all, b_all = params
    x2d = x.reshape(B * T, H)            # contiguous -> free metadata reshape

    out2d = pl.pallas_call(
        prenet_kernel,
        out_shape=jax.ShapeDtypeStruct((B * T, OUT), jnp.float32),
        in_specs=[
            pl.BlockSpec(memory_space=pltpu.MemorySpace.VMEM),   # x
            pl.BlockSpec(memory_space=pltpu.MemorySpace.VMEM),   # packed weights
            pl.BlockSpec(memory_space=pltpu.MemorySpace.VMEM),   # packed biases
        ],
        out_specs=pl.BlockSpec(memory_space=pltpu.MemorySpace.VMEM),
    )(x2d, w_all, b_all)

    return out2d.reshape(B, T, OUT)


# ---------------------------------------------------------------------------
# Pure-JAX reference (exact Mish, explicit tap loop) for a correctness check.
# ---------------------------------------------------------------------------
def prenet_ref(x, params):
    w_all, b_all = params
    w1 = w_all[_W1_OFF:_W1_OFF + K * H].reshape(K, H, H)   # [k, in, out]
    w2 = w_all[_W2_OFF:_W2_OFF + K * H].reshape(K, H, H)
    fcw = w_all[_FC_OFF:_FC_OFF + H]                        # [in, out]
    b1, b2, fcb = b_all[0], b_all[1], b_all[2]

    hp = jax.lax.Precision.HIGHEST

    def conv(inp, w, b):                                  # inp: [B, T, H]
        ipad = jnp.pad(inp, ((0, 0), (1, 1), (0, 0)))
        out = b[None, None, :]
        for k in range(K):
            out = out + jnp.einsum("bti,io->bto", ipad[:, k:k + T, :], w[k],
                                   precision=hp)
        return out

    def mish_exact(v):
        return v * jnp.tanh(jax.nn.softplus(v))

    h1 = mish_exact(conv(x, w1, b1))
    h2 = mish_exact(conv(h1, w2, b2))
    return jnp.einsum("bti,io->bto", h2, fcw, precision=hp) + fcb[None, None, :] + x


# ---------------------------------------------------------------------------
# Deterministic parameter construction (shapes from Prenet.__init__),
# packed into two buffers to coalesce the parameter DMAs.
# ---------------------------------------------------------------------------
def make_params(key):
    ks = jax.random.split(key, 6)
    # Conv weights in PyTorch layout [c_out, c_in, k]; transpose to
    # [k, c_in, c_out] and flatten tap-major to (K*H, H) so row block k is
    # the (in, out) matrix of tap k.
    conv_scale = 1.0 / np.sqrt(H * K)
    w1_pt = jax.random.normal(ks[0], (H, H, K), jnp.float32) * conv_scale
    w2_pt = jax.random.normal(ks[1], (H, H, K), jnp.float32) * conv_scale
    w1cat = jnp.transpose(w1_pt, (2, 1, 0)).reshape(K * H, H)
    w2cat = jnp.transpose(w2_pt, (2, 1, 0)).reshape(K * H, H)
    # Linear: PyTorch weight is [out, in]; store transposed [in, out].
    fc_scale = 1.0 / np.sqrt(H)
    fcw = jax.random.normal(ks[4], (H, OUT), jnp.float32) * fc_scale

    b1 = jax.random.normal(ks[2], (H,), jnp.float32) * 0.01
    b2 = jax.random.normal(ks[3], (H,), jnp.float32) * 0.01
    fcb = jax.random.normal(ks[5], (OUT,), jnp.float32) * 0.01

    w_all = jnp.concatenate([w1cat, w2cat, fcw], axis=0)   # (2*K*H + H, H)
    b_all = jnp.stack([b1, b2, fcb], axis=0)               # (3, H)
    return (w_all, b_all)


if __name__ == "__main__":
    key = jax.random.PRNGKey(0)
    k_x, k_p = jax.random.split(key)
    x = jax.random.normal(k_x, (B, T, H), jnp.float32)
    params = make_params(k_p)

    out = prenet_pallas(x, params)
    out = jax.block_until_ready(out)

    ref = jax.block_until_ready(prenet_ref(x, params))
    np.testing.assert_allclose(np.asarray(out), np.asarray(ref),
                               rtol=1e-4, atol=1e-4)
    print("KERNEL_OK")
</pallas_src>

<mosaic_0001>
module attributes {stable_mosaic.version = 11 : i64} {
  func.func @prenet_kernel(%arg0: memref<32x32xf32, #tpu.memory_space<vmem>>, %arg1: memref<224x32xf32, #tpu.memory_space<vmem>>, %arg2: memref<3x32xf32, #tpu.memory_space<vmem>>, %arg3: memref<32x32xf32, #tpu.memory_space<vmem>>) attributes {dimension_semantics = [], scalar_prefetch = 0 : i64, scratch_operands = 0 : i64, tpu.core_type = #tpu.core_type<tc>} {
    %c0 = arith.constant 0 : index
    %c0_0 = arith.constant 0 : index
    %0 = vector.load %arg0[%c0, %c0_0] : memref<32x32xf32, #tpu.memory_space<vmem>>, vector<32x32xf32>
    %1 = tpu.iota {dimensions = array<i32: 0>} : vector<32x32xi32>
    %c16_i32 = arith.constant 16 : i32
    %c0_i32 = arith.constant 0 : i32
    %2 = arith.cmpi eq, %c16_i32, %c0_i32 : i32
    %c1_i32 = arith.constant 1 : i32
    %3 = arith.select %2, %c1_i32, %c16_i32 : i32
    %4 = vector.broadcast %3 : i32 to vector<32x32xi32>
    %5 = arith.remsi %1, %4 : vector<32x32xi32>
    %c0_i32_1 = arith.constant 0 : i32
    %6 = vector.broadcast %c0_i32_1 : i32 to vector<32x32xi32>
    %7 = arith.cmpi ne, %5, %6 : vector<32x32xi32>
    %c0_i32_2 = arith.constant 0 : i32
    %8 = vector.broadcast %c0_i32_2 : i32 to vector<32x32xi32>
    %9 = arith.cmpi slt, %5, %8 : vector<32x32xi32>
    %c0_i32_3 = arith.constant 0 : i32
    %10 = arith.cmpi slt, %3, %c0_i32_3 : i32
    %11 = vector.broadcast %10 : i1 to vector<32x32xi1>
    %12 = vector.broadcast %11 : vector<32x32xi1> to vector<32x32xi1>
    %13 = arith.xori %9, %12 : vector<32x32xi1>
    %14 = arith.andi %13, %7 : vector<32x32xi1>
    %15 = vector.broadcast %3 : i32 to vector<32x32xi32>
    %16 = arith.addi %5, %15 : vector<32x32xi32>
    %17 = arith.select %14, %16, %5 : vector<32x32xi1>, vector<32x32xi32>
    %c0_i32_4 = arith.constant 0 : i32
    %18 = vector.broadcast %c0_i32_4 : i32 to vector<32x32xi32>
    %19 = arith.cmpi ne, %17, %18 : vector<32x32xi32>
    %c15_i32 = arith.constant 15 : i32
    %20 = vector.broadcast %c15_i32 : i32 to vector<32x32xi32>
    %21 = arith.cmpi ne, %17, %20 : vector<32x32xi32>
    %c1_i32_5 = arith.constant 1 : i32
    %22 = tpu.dynamic_rotate %0 by %c1_i32_5 dim 0 : vector<32x32xf32>, i32 -> vector<32x32xf32>
    %cst = arith.constant 0.000000e+00 : f32
    %23 = vector.broadcast %cst : f32 to vector<32x32xf32>
    %24 = arith.select %19, %22, %23 : vector<32x32xi1>, vector<32x32xf32>
    %c31_i32 = arith.constant 31 : i32
    %25 = tpu.dynamic_rotate %0 by %c31_i32 dim 0 : vector<32x32xf32>, i32 -> vector<32x32xf32>
    %cst_6 = arith.constant 0.000000e+00 : f32
    %26 = vector.broadcast %cst_6 : f32 to vector<32x32xf32>
    %27 = arith.select %21, %25, %26 : vector<32x32xi1>, vector<32x32xf32>
    %c0_7 = arith.constant 0 : index
    %c0_8 = arith.constant 0 : index
    %28 = vector.load %arg1[%c0_7, %c0_8] : memref<224x32xf32, #tpu.memory_space<vmem>>, vector<32x32xf32>
    %cst_9 = arith.constant dense<0.000000e+00> : vector<32x32xf32>
    %29 = tpu.matmul %24, %28, %cst_9 {dimension_numbers = #tpu.dot_dimension_numbers<[1], [0], [0], [1], [0, 0, 1, 1], [], []>} : vector<32x32xf32>, vector<32x32xf32>, vector<32x32xf32> -> vector<32x32xf32>
    %c32 = arith.constant 32 : index
    %c0_10 = arith.constant 0 : index
    %30 = vector.load %arg1[%c32, %c0_10] : memref<224x32xf32, #tpu.memory_space<vmem>>, vector<32x32xf32>
    %cst_11 = arith.constant dense<0.000000e+00> : vector<32x32xf32>
    %31 = tpu.matmul %0, %30, %cst_11 {dimension_numbers = #tpu.dot_dimension_numbers<[1], [0], [0], [1], [0, 0, 1, 1], [], []>} : vector<32x32xf32>, vector<32x32xf32>, vector<32x32xf32> -> vector<32x32xf32>
    %32 = arith.addf %29, %31 : vector<32x32xf32>
    %c64 = arith.constant 64 : index
    %c0_12 = arith.constant 0 : index
    %33 = vector.load %arg1[%c64, %c0_12] : memref<224x32xf32, #tpu.memory_space<vmem>>, vector<32x32xf32>
    %cst_13 = arith.constant dense<0.000000e+00> : vector<32x32xf32>
    %34 = tpu.matmul %27, %33, %cst_13 {dimension_numbers = #tpu.dot_dimension_numbers<[1], [0], [0], [1], [0, 0, 1, 1], [], []>} : vector<32x32xf32>, vector<32x32xf32>, vector<32x32xf32> -> vector<32x32xf32>
    %35 = arith.addf %32, %34 : vector<32x32xf32>
    %c0_14 = arith.constant 0 : index
    %c0_15 = arith.constant 0 : index
    %36 = vector.load %arg2[%c0_14, %c0_15] : memref<3x32xf32, #tpu.memory_space<vmem>>, vector<1x32xf32>
    %37 = vector.broadcast %36 : vector<1x32xf32> to vector<32x32xf32>
    %38 = arith.addf %35, %37 : vector<32x32xf32>
    %cst_16 = arith.constant 2.000000e+01 : f32
    %39 = vector.broadcast %cst_16 : f32 to vector<32x32xf32>
    %40 = arith.minimumf %38, %39 : vector<32x32xf32>
    %41 = math.exp %40 : vector<32x32xf32>
    %cst_17 = arith.constant 2.000000e+00 : f32
    %42 = vector.broadcast %cst_17 : f32 to vector<32x32xf32>
    %43 = arith.addf %41, %42 : vector<32x32xf32>
    %44 = arith.mulf %41, %43 : vector<32x32xf32>
    %45 = arith.mulf %38, %44 : vector<32x32xf32>
    %cst_18 = arith.constant 2.000000e+00 : f32
    %46 = vector.broadcast %cst_18 : f32 to vector<32x32xf32>
    %47 = arith.addf %44, %46 : vector<32x32xf32>
    %48 = arith.divf %45, %47 : vector<32x32xf32>
    %cst_19 = arith.constant 2.000000e+01 : f32
    %49 = vector.broadcast %cst_19 : f32 to vector<32x32xf32>
    %50 = arith.cmpf ogt, %38, %49 : vector<32x32xf32>
    %51 = arith.select %50, %38, %48 : vector<32x32xi1>, vector<32x32xf32>
    %c1_i32_20 = arith.constant 1 : i32
    %52 = tpu.dynamic_rotate %51 by %c1_i32_20 dim 0 : vector<32x32xf32>, i32 -> vector<32x32xf32>
    %cst_21 = arith.constant 0.000000e+00 : f32
    %53 = vector.broadcast %cst_21 : f32 to vector<32x32xf32>
    %54 = arith.select %19, %52, %53 : vector<32x32xi1>, vector<32x32xf32>
    %c31_i32_22 = arith.constant 31 : i32
    %55 = tpu.dynamic_rotate %51 by %c31_i32_22 dim 0 : vector<32x32xf32>, i32 -> vector<32x32xf32>
    %cst_23 = arith.constant 0.000000e+00 : f32
    %56 = vector.broadcast %cst_23 : f32 to vector<32x32xf32>
    %57 = arith.select %21, %55, %56 : vector<32x32xi1>, vector<32x32xf32>
    %c96 = arith.constant 96 : index
    %c0_24 = arith.constant 0 : index
    %58 = vector.load %arg1[%c96, %c0_24] : memref<224x32xf32, #tpu.memory_space<vmem>>, vector<32x32xf32>
    %cst_25 = arith.constant dense<0.000000e+00> : vector<32x32xf32>
    %59 = tpu.matmul %54, %58, %cst_25 {dimension_numbers = #tpu.dot_dimension_numbers<[1], [0], [0], [1], [0, 0, 1, 1], [], []>} : vector<32x32xf32>, vector<32x32xf32>, vector<32x32xf32> -> vector<32x32xf32>
    %c128 = arith.constant 128 : index
    %c0_26 = arith.constant 0 : index
    %60 = vector.load %arg1[%c128, %c0_26] : memref<224x32xf32, #tpu.memory_space<vmem>>, vector<32x32xf32>
    %cst_27 = arith.constant dense<0.000000e+00> : vector<32x32xf32>
    %61 = tpu.matmul %51, %60, %cst_27 {dimension_numbers = #tpu.dot_dimension_numbers<[1], [0], [0], [1], [0, 0, 1, 1], [], []>} : vector<32x32xf32>, vector<32x32xf32>, vector<32x32xf32> -> vector<32x32xf32>
    %62 = arith.addf %59, %61 : vector<32x32xf32>
    %c160 = arith.constant 160 : index
    %c0_28 = arith.constant 0 : index
    %63 = vector.load %arg1[%c160, %c0_28] : memref<224x32xf32, #tpu.memory_space<vmem>>, vector<32x32xf32>
    %cst_29 = arith.constant dense<0.000000e+00> : vector<32x32xf32>
    %64 = tpu.matmul %57, %63, %cst_29 {dimension_numbers = #tpu.dot_dimension_numbers<[1], [0], [0], [1], [0, 0, 1, 1], [], []>} : vector<32x32xf32>, vector<32x32xf32>, vector<32x32xf32> -> vector<32x32xf32>
    %65 = arith.addf %62, %64 : vector<32x32xf32>
    %c1 = arith.constant 1 : index
    %c0_30 = arith.constant 0 : index
    %66 = vector.load %arg2[%c1, %c0_30] : memref<3x32xf32, #tpu.memory_space<vmem>>, vector<1x32xf32>
    %67 = vector.broadcast %66 : vector<1x32xf32> to vector<32x32xf32>
    %68 = arith.addf %65, %67 : vector<32x32xf32>
    %cst_31 = arith.constant 2.000000e+01 : f32
    %69 = vector.broadcast %cst_31 : f32 to vector<32x32xf32>
    %70 = arith.minimumf %68, %69 : vector<32x32xf32>
    %71 = math.exp %70 : vector<32x32xf32>
    %cst_32 = arith.constant 2.000000e+00 : f32
    %72 = vector.broadcast %cst_32 : f32 to vector<32x32xf32>
    %73 = arith.addf %71, %72 : vector<32x32xf32>
    %74 = arith.mulf %71, %73 : vector<32x32xf32>
    %75 = arith.mulf %68, %74 : vector<32x32xf32>
    %cst_33 = arith.constant 2.000000e+00 : f32
    %76 = vector.broadcast %cst_33 : f32 to vector<32x32xf32>
    %77 = arith.addf %74, %76 : vector<32x32xf32>
    %78 = arith.divf %75, %77 : vector<32x32xf32>
    %cst_34 = arith.constant 2.000000e+01 : f32
    %79 = vector.broadcast %cst_34 : f32 to vector<32x32xf32>
    %80 = arith.cmpf ogt, %68, %79 : vector<32x32xf32>
    %81 = arith.select %80, %68, %78 : vector<32x32xi1>, vector<32x32xf32>
    %c192 = arith.constant 192 : index
    %c0_35 = arith.constant 0 : index
    %82 = vector.load %arg1[%c192, %c0_35] : memref<224x32xf32, #tpu.memory_space<vmem>>, vector<32x32xf32>
    %cst_36 = arith.constant dense<0.000000e+00> : vector<32x32xf32>
    %83 = tpu.matmul %81, %82, %cst_36 {dimension_numbers = #tpu.dot_dimension_numbers<[1], [0], [0], [1], [0, 0, 1, 1], [], []>} : vector<32x32xf32>, vector<32x32xf32>, vector<32x32xf32> -> vector<32x32xf32>
    %c2 = arith.constant 2 : index
    %c0_37 = arith.constant 0 : index
    %84 = vector.load %arg2[%c2, %c0_37] : memref<3x32xf32, #tpu.memory_space<vmem>>, vector<1x32xf32>
    %85 = vector.broadcast %84 : vector<1x32xf32> to vector<32x32xf32>
    %86 = arith.addf %83, %85 : vector<32x32xf32>
    %87 = arith.addf %86, %0 : vector<32x32xf32>
    %c0_38 = arith.constant 0 : index
    %c0_39 = arith.constant 0 : index
    %88 = vector.load %arg3[%c0_38, %c0_39] : memref<32x32xf32, #tpu.memory_space<vmem>>, vector<32x32xf32>
    tpu.vector_store %arg3[%c0_38, %c0_39], %87 {strides = array<i32>} : memref<32x32xf32, #tpu.memory_space<vmem>>, vector<32x32xf32>,
    return
  }
}

</mosaic_0001>

<bundles_post_ra>
// kernel: tpu_custom_call.1
= control target key start
LH: loop header
LB: loop body
LE: loop exit
PB: predicated region body
PF: predicated region fallthrough
CT: control target
= control target key end

     0   :  { %vm114_vm0 = vcmask 261120   ;;  %v19_v3 = vlaneseq  ;;  %s1585_s0 = inlined_call_operand.vmem [shape: f32[32,32], index: 0, kind: input, shape index: {}]   ;;  %s1586_s1 = inlined_call_operand.vmem [shape: f32[224,32], index: 1, kind: input, shape index: {}]   ;;  %s1587_s2 = inlined_call_operand.vmem [shape: f32[3,32], index: 2, kind: input, shape index: {}]   ;;  %s1588_s3 = inlined_call_operand.hbm [shape: f32[32,32], index: 3, kind: output, shape index: {}]  }
   0x1   :  { %v110_v0 = vld [vmem:[%s1586_s1 + $0x20] sm:$0xff]  ;;  %v111_v1 = vld [vmem:[%s1586_s1 + $0x28] sm:$0xff]  ;;  %v112_v2 = vld [vmem:[%s1586_s1 + $0x30] sm:$0xff] }
   0x2   :  { %v1166_v4 = vpack.c.bf16 %v111_v1, %v110_v0  ;;  %v113_v5 = vld [vmem:[%s1586_s1 + $0x38] sm:$0xff]  ;;  %v1339_v6 = vld [vmem:[%s1585_s0] sm:$0xff]  ;;  %v107_v9 = vld [vmem:[%s1586_s1 + $0x8] sm:$0xff]  ;;  %v1354_v11 = vshrl.u32 %v19_v3, 7 }
   0x3   :  { %v1170_v7 = vpack.c.bf16 %v113_v5, %v112_v2  ;;  %1076 = vmatprep.mubr.msk.f32.mxu0 %vm114_vm0, %v1339_v6  ;;  %v106_v8 = vld [vmem:[%s1586_s1] sm:$0xff]  ;;  %v1352_v10 = vld [vmem:[%s1585_s0 + $0x18] sm:$0xff] }
   0x4   :  { %1167 = vmatprep.subr.bf16.mxu0 %v1166_v4  ;;  %v1174_v12 = vpack.c.bf16 %v107_v9, %v106_v8 }
   0x5   :  { %1169 = vmatpush3.bf16.msra.mxu0 %v1166_v4 }
   0x6   :  { %1171 = vmatprep.subr.bf16.mxu0 %v1170_v7 }
   0x7   :  { %8 = vsyncpa [#allocation3], 0  ;;  %v80_v13 = vrot.slane %v1339_v6, 7  ;;  %v83_v14 = vrot.slane %v1352_v10, 7  ;;  %v108_v15 = vld [vmem:[%s1586_s1 + $0x10] sm:$0xff]  ;;  %v109_v16 = vld [vmem:[%s1586_s1 + $0x18] sm:$0xff] }
   0x8   :  { %v28_v17 = vand.u32 15, %v1354_v11  ;;  %v22_v18 = vadd.s32 16, %v1354_v11  ;;  %vm84_vm1 = vcmp.lt.s32.totalorder %v1354_v11, 1  ;;  %v1370_v19 = vld [vmem:[%s1585_s0 + $0x8] sm:$0xff]  ;;  %v1375_v20 = vld [vmem:[%s1585_s0 + $0x10] sm:$0xff]  ;;  %v1178_v21 = vpack.c.bf16 %v109_v16, %v108_v15  ;;  %v309_v25 = vld [vmem:[%s1586_s1 + $0x40] sm:$0xff] }
   0x9   :  { %1173 = vmatpush3.bf16.msra.mxu0 %v1170_v7  ;;  %v82_v22 = vrot.slane %v1375_v20, 7  ;;  %v88_v24 = vsel %vm84_vm1, %v83_v14, %v80_v13  ;;  %v310_v26 = vld [vmem:[%s1586_s1 + $0x48] sm:$0xff]  ;;  %v81_v28 = vrot.slane %v1370_v19, 7  ;;  %v21_v31 = vadd.s32 8, %v1354_v11  ;;  %v311_v34 = vld [vmem:[%s1586_s1 + $0x50] sm:$0xff]  ;;  %v312_v35 = vld [vmem:[%s1586_s1 + $0x58] sm:$0xff] }
   0xa   :  { %1175 = vmatprep.subr.bf16.mxu0 %v1174_v12  ;;  %vm1378_vm2 = vcmp.ne.s32.totalorder %v28_v17, 0  ;;  %v42_v27 = vand.u32 15, %v22_v18  ;;  %v1182_v30 = vpack.c.bf16 %v310_v26, %v309_v25  ;;  %v93_v36 = vrot.slane %v1339_v6, 1  ;;  %v495_v55 = vld [vmem:[%s1586_s1 + $0x80] sm:$0xff]  ;;  %v496_v56 = vld [vmem:[%s1586_s1 + $0x88] sm:$0xff]  ;;  %v497_v57 = vld [vmem:[%s1586_s1 + $0x90] sm:$0xff] }
   0xb   :  { %v89_v29 = vsel %vm1378_vm2, %v88_v24, 0.0  ;;  %v86_v33 = vsel %vm84_vm1, %v81_v28, %v82_v22  ;;  %v94_v37 = vrot.slane %v1370_v19, 1  ;;  %v95_v38 = vrot.slane %v1375_v20, 1  ;;  %v498_v59 = vld [vmem:[%s1586_s1 + $0x98] sm:$0xff]  ;;  %v491_v61 = vld [vmem:[%s1586_s1 + $0x60] sm:$0xff]  ;;  %v492_v62 = vld [vmem:[%s1586_s1 + $0x68] sm:$0xff] }
   0xc   :  { %1077 = vmatmul.mubr.msk.f32.vlgmr.msra.gmra.mrb[0].mxu0 %vm114_vm0, %v1370_v19  ;;  %vm1398_vm3 = vcmp.ne.s32.totalorder %v42_v27, 0  ;;  %v87_v39 = vsel %vm84_vm1, %v80_v13, %v81_v28  ;;  %v1186_v41 = vpack.c.bf16 %v312_v35, %v311_v34  ;;  %v35_v42 = vand.u32 15, %v21_v31  ;;  %v993_v0 = vld [vmem:[%s1587_s2] ss:$0 sm:$0xff]  ;;  %v853_v47 = vld [vmem:[%s1586_s1 + $0xd0] sm:$0xff]  ;;  %v854_v52 = vld [vmem:[%s1586_s1 + $0xd8] sm:$0xff] }
   0xd   :  { %1177 = vmatpush3.bf16.msra.mxu0 %v1174_v12  ;;  %1079 = vmatprep.mubr.msk.f32.mxu0 %vm114_vm0, %v1375_v20  ;;  %v91_v40 = vsel %vm1398_vm3, %v86_v33, 0.0  ;;  %v23_v43 = vadd.s32 24, %v1354_v11  ;;  %vm97_vm4 = vcmp.lt.s32.totalorder %v1354_v11, 7  ;;  %v96_v44 = vrot.slane %v1352_v10, 1  ;;  %v851_v32 = vld [vmem:[%s1586_s1 + $0xc0] sm:$0xff]  ;;  %s1301_s25 = smov [#allocation2]  }
   0xe   :  { %1179 = vmatprep.subr.bf16.mxu0 %v1178_v21  ;;  %v85_v45 = vsel %vm84_vm1, %v82_v22, %v83_v14  ;;  %v100_v46 = vsel %vm97_vm4, %v93_v36, %v94_v37  ;;  %vm1429_vm5 = vcmp.ne.s32.totalorder %v35_v42, 15  ;;  %v99_v48 = vsel %vm97_vm4, %v94_v37, %v95_v38  ;;  %s970_s26 = sshll.u32 %s1301_s25, 4  ;;  %s971_s26 = int_to_ptr.vmem [resolvable:$true] %s970_s26 }
   0xf   :  { %v49_v49 = vand.u32 15, %v23_v43  ;;  %v103_v50 = vsel %vm1429_vm5, %v99_v48, 0.0  ;;  %v98_v51 = vsel %vm97_vm4, %v95_v38, %v96_v44  ;;  %v101_v53 = vsel %vm97_vm4, %v96_v44, %v93_v36  ;;  %v493_v43 = vld [vmem:[%s1586_s1 + $0x70] sm:$0xff]  ;;  %v494_v44 = vld [vmem:[%s1586_s1 + $0x78] sm:$0xff]  ;;  %p1282_p1 = scmp.lt.s32.totalorder %s971_s26, %s971_s26 }
  0x10   :  { %1080 = vmatmul.mubr.msk.f32.gmra.mrb[2].mxu0 %vm114_vm0, %v1352_v10  ;;  %v1190_v58 = vpack.c.bf16 %v496_v56, %v495_v55  ;;  %v1194_v60 = vpack.c.bf16 %v498_v59, %v497_v57  ;;  %v1470_v63 = vpack.c.bf16 %v492_v62, %v491_v61  ;;  %v693_v62 = vld [vmem:[%s1586_s1 + $0xa0] sm:$0xff] }
  0x11   :  { %1181 = vmatpush3.bf16.msra.mxu0 %v1178_v21  ;;  %1090 = vmatprep.mubr.msk.f32.mxu0 %vm114_vm0, %v89_v29  ;;  %vm1441_vm6 = vcmp.ne.s32.totalorder %v49_v49, 15 }
  0x12   :  { %1183 = vmatprep.subr.bf16.mxu0 %v1182_v30  ;;  %v105_v54 = vsel %vm1441_vm6, %v101_v53, 0.0  ;;  %1191 = vmatprep.subr.bf16.mxu1 %v1190_v58 }
  0x13   :  { %1193 = vmatpush3.bf16.msra.mxu1 %v1190_v58 }
  0x14   :  { %1091 = vmatmul.mubr.msk.f32.vlgmr.msra.gmra.mrb[0].mxu0 %vm114_vm0, %v87_v39  ;;  %1195 = vmatprep.subr.bf16.mxu1 %v1194_v60 }
  0x15   :  { %1185 = vmatpush3.bf16.msra.mxu0 %v1182_v30  ;;  %1093 = vmatprep.mubr.msk.f32.mxu0 %vm114_vm0, %v91_v40 }
  0x16   :  { %1187 = vmatprep.subr.bf16.mxu0 %v1186_v41 }
  0x17   :  { %1197 = vmatpush3.bf16.msra.mxu1 %v1194_v60 }
  0x18   :  { %1094 = vmatmul.mubr.msk.f32.gmra.mrb[2].mxu0 %vm114_vm0, %v85_v45  ;;  %1199 = vmatprep.subr.bf16.mxu1 %v1470_v63 }
  0x19   :  { %1189 = vmatpush3.bf16.msra.mxu0 %v1186_v41  ;;  %1104 = vmatprep.mubr.msk.f32.mxu0 %vm114_vm0, %v100_v46 }
  0x1c   :  { %1105 = vmatmul.mubr.msk.f32.vlgmr.msra.gmra.mrb[0].mxu0 %vm114_vm0, %v103_v50 }
  0x1d   :  { %1107 = vmatprep.mubr.msk.f32.mxu0 %vm114_vm0, %v98_v51  ;;  %v1202_v51 = vpack.c.bf16 %v494_v44, %v493_v43 }
  0x20   :  { %1108 = vmatmul.mubr.msk.f32.gmra.mrb[2].mxu0 %vm114_vm0, %v105_v54 }
  0xef   :  { %v1106_v1 = vpop.f32.mrb[0].mxu0 }
  0xf0   :  { %v420_v2 = vadd.f32 %v1106_v1, %v993_v0  ;;  %v391_v3 = vpop.f32.mrb[1].mxu0 }
  0xf1   :  { %v419_v4 = vadd.f32 %v993_v0, %v391_v3 }
  0xf2   :  { %v424_v5 = vmin.f32 %v420_v2, 20.0  ;;  %vm460_vm7 = vcmp.gt.f32.partialorder %v420_v2, 20.0 }
  0xf3   :  { %v423_v7 = vmin.f32 %v419_v4, 20.0  ;;  %v1109_v8 = vpop.f32.mrb[2].mxu0  ;;  %vm459_vm8 = vcmp.gt.f32.partialorder %v419_v4, 20.0 }
  0xf4   :  { %v429_v9 = vmul.f32 1.442695, %v424_v5  ;;  %v1476_v12 = vadd.f32 %v1109_v8, %v993_v0  ;;  %v401_v13 = vpop.f32.mrb[3].mxu0 }
  0xf5   :  { %v427_v14 = vmul.f32 1.442695, %v423_v7  ;;  %v1478_v15 = vadd.f32 %v993_v0, %v401_v13  ;;  %v694_v0 = vld [vmem:[%s1586_s1 + $0xa8] sm:$0xff] }
  0xf6   :  { %1245 = vpow2.f32 %v429_v9  ;;  %v426_v16 = vmin.f32 %v1476_v12, 20.0  ;;  %vm462_vm9 = vcmp.gt.f32.partialorder %v1476_v12, 20.0  ;;  %v1206_v9 = vpack.c.bf16 %v694_v0, %v693_v62 }
  0xf7   :  { %1247 = vpow2.f32 %v427_v14  ;;  %v425_v17 = vmin.f32 %v1478_v15, 20.0  ;;  %vm461_vm10 = vcmp.gt.f32.partialorder %v1478_v15, 20.0 }
  0xf8   :  { %v433_v18 = vmul.f32 1.442695, %v426_v16 }
  0xf9   :  { %v431_v21 = vmul.f32 1.442695, %v425_v17 }
  0xfa   :  { %1249 = vpow2.f32 %v433_v18 }
  0xfb   :  { %1251 = vpow2.f32 %v431_v21 }
 0x100   :  { %v1246_v22 = vpop.eup %1245 }
 0x101   :  { %v1248_v24 = vpop.eup %1247  ;;  %v436_v25 = vadd.f32 2.0, %v1246_v22 }
 0x102   :  { %v435_v26 = vadd.f32 2.0, %v1248_v24 }
 0x103   :  { %v440_v27 = vmul.f32 %v1246_v22, %v436_v25 }
 0x104   :  { %v1250_v28 = vpop.eup %1249  ;;  %v439_v29 = vmul.f32 %v1248_v24, %v435_v26 }
 0x105   :  { %v1252_v30 = vpop.eup %1251  ;;  %v448_v31 = vadd.f32 2.0, %v440_v27  ;;  %v438_v33 = vadd.f32 2.0, %v1250_v28  ;;  %v444_v40 = vmul.f32 %v440_v27, %v420_v2  ;;  %v852_v27 = vld [vmem:[%s1586_s1 + $0xc8] sm:$0xff] }
 0x106   :  { %v437_v34 = vadd.f32 2.0, %v1252_v30  ;;  %v447_v35 = vadd.f32 2.0, %v439_v29  ;;  %v443_v42 = vmul.f32 %v439_v29, %v419_v4  ;;  %v1218_v29 = vpack.c.bf16 %v854_v52, %v853_v47 }
 0x107   :  { %1253 = vrcp.f32 %v448_v31  ;;  %v442_v36 = vmul.f32 %v1250_v28, %v438_v33  ;;  %v1214_v28 = vpack.c.bf16 %v852_v27, %v851_v32 }
 0x108   :  { %v441_v37 = vmul.f32 %v1252_v30, %v437_v34  ;;  %1255 = vrcp.f32 %v447_v35  ;;  %v1006_v30 = vld [vmem:[%s1587_s2 + $0x1] ss:$0 sm:$0xff] }
 0x109   :  { %v450_v38 = vadd.f32 2.0, %v442_v36  ;;  %v446_v49 = vmul.f32 %v442_v36, %v1476_v12  ;;  %1215 = vmatprep.subr.bf16.mxu0 %v1214_v28 }
 0x10a   :  { %v449_v39 = vadd.f32 2.0, %v441_v37  ;;  %v445_v54 = vmul.f32 %v441_v37, %v1478_v15  ;;  %1217 = vmatpush3.bf16.msra.mxu0 %v1214_v28 }
 0x10b   :  { %1257 = vrcp.f32 %v450_v38  ;;  %1219 = vmatprep.subr.bf16.mxu0 %v1218_v29 }
 0x10c   :  { %1259 = vrcp.f32 %v449_v39 }
 0x10e   :  { %1221 = vmatpush3.bf16.msra.mxu0 %v1218_v29 }
 0x111   :  { %v1254_v41 = vpop.eup %1253 }
 0x112   :  { %v1256_v45 = vpop.eup %1255  ;;  %v454_v46 = vmul.f32 %v1254_v41, %v444_v40 }
 0x113   :  { %v452_v48 = vmul.f32 %v1256_v45, %v443_v42 }
 0x114   :  { %v464_v50 = vsel %vm460_vm7, %v420_v2, %v454_v46 }
 0x115   :  { %v1258_v53 = vpop.eup %1257  ;;  %v463_v55 = vsel %vm459_vm8, %v419_v4, %v452_v48  ;;  %v468_v56 = vrot.slane %v464_v50, 7  ;;  %v480_v57 = vrot.slane %v464_v50, 1 }
 0x116   :  { %v1260_v58 = vpop.eup %1259  ;;  %v467_v59 = vrot.slane %v463_v55, 7  ;;  %v479_v60 = vrot.slane %v463_v55, 1  ;;  %1118 = vmatprep.mubr.msk.f32.mxu1 %vm114_vm0, %v463_v55  ;;  %v458_v61 = vmul.f32 %v1258_v53, %v446_v49 }
 0x117   :  { %1119 = vmatmul.mubr.msk.f32.vlgmr.msra.gmra.mrb[0].mxu1 %vm114_vm0, %v464_v50  ;;  %v456_v1 = vmul.f32 %v1260_v58, %v445_v54 }
 0x118   :  { %1201 = vmatpush3.bf16.msra.mxu1 %v1470_v63  ;;  %v466_v2 = vsel %vm462_vm9, %v1476_v12, %v458_v61  ;;  %v473_v3 = vsel %vm84_vm1, %v467_v59, %v468_v56  ;;  %v485_v4 = vsel %vm97_vm4, %v479_v60, %v480_v57  ;;  %v695_v63 = vld [vmem:[%s1586_s1 + $0xb0] sm:$0xff]  ;;  %v696_v12 = vld [vmem:[%s1586_s1 + $0xb8] sm:$0xff] }
 0x119   :  { %v465_v5 = vsel %vm461_vm10, %v1478_v15, %v456_v1  ;;  %v470_v7 = vrot.slane %v466_v2, 7  ;;  %v482_v8 = vrot.slane %v466_v2, 1  ;;  %1203 = vmatprep.subr.bf16.mxu1 %v1202_v51  ;;  %v1210_v24 = vpack.c.bf16 %v696_v12, %v695_v63 }
 0x11a   :  { %v469_v13 = vrot.slane %v465_v5, 7  ;;  %v481_v14 = vrot.slane %v465_v5, 1  ;;  %1121 = vmatprep.mubr.msk.f32.mxu1 %vm114_vm0, %v465_v5 }
 0x11b   :  { %1122 = vmatmul.mubr.msk.f32.gmra.mrb[2].mxu1 %vm114_vm0, %v466_v2  ;;  %v474_v15 = vsel %vm84_vm1, %v470_v7, %v467_v59  ;;  %v486_v16 = vsel %vm97_vm4, %v482_v8, %v479_v60 }
 0x11c   :  { %1205 = vmatpush3.bf16.msra.mxu1 %v1202_v51  ;;  %v475_v17 = vsel %vm1378_vm2, %v474_v15, 0.0  ;;  %v472_v18 = vsel %vm84_vm1, %v468_v56, %v469_v13  ;;  %v471_v21 = vsel %vm84_vm1, %v469_v13, %v470_v7  ;;  %v484_v22 = vsel %vm97_vm4, %v480_v57, %v481_v14 }
 0x11d   :  { %1132 = vmatprep.mubr.msk.f32.mxu1 %vm114_vm0, %v475_v17  ;;  %1207 = vmatprep.subr.bf16.mxu1 %v1206_v9  ;;  %v483_v25 = vsel %vm97_vm4, %v481_v14, %v482_v8  ;;  %v477_v23 = vsel %vm1398_vm3, %v472_v18, 0.0  ;;  %v488_v26 = vsel %vm1429_vm5, %v484_v22, 0.0  ;;  %v490_v11 = vsel %vm1441_vm6, %v486_v16, 0.0 }
 0x11f   :  { %1133 = vmatmul.mubr.msk.f32.vlgmr.msra.gmra.mrb[0].mxu1 %vm114_vm0, %v473_v3 }
 0x120   :  { %1135 = vmatprep.mubr.msk.f32.mxu1 %vm114_vm0, %v477_v23  ;;  %1209 = vmatpush3.bf16.msra.mxu1 %v1206_v9 }
 0x121   :  { %1211 = vmatprep.subr.bf16.mxu1 %v1210_v24 }
 0x123   :  { %1136 = vmatmul.mubr.msk.f32.gmra.mrb[2].mxu1 %vm114_vm0, %v471_v21 }
 0x124   :  { %1213 = vmatpush3.bf16.msra.mxu1 %v1210_v24  ;;  %1146 = vmatprep.mubr.msk.f32.mxu1 %vm114_vm0, %v485_v4  ;;  %v1007_v24 = vld [vmem:[%s1587_s2 + $0x2] ss:$0 sm:$0xff]  ;;  %s1277_s2 = scalar_lea.vmem %s971_s26, 512 }
 0x125   :  { %1222 = vmatprep.subr.bf16.mxu1 %v1214_v28  ;;  %p1278_p0 = scmp.ne.s32.totalorder %s971_s26, %s1277_s2  ;;  %p1283_p2 = scmp.lt.s32.totalorder %s1277_s2, %s1277_s2 }
 0x127   :  { %1147 = vmatmul.mubr.msk.f32.vlgmr.msra.gmra.mrb[0].mxu1 %vm114_vm0, %v488_v26  ;;  %p1284_p3 = por %p1283_p2, %p1282_p1 }
 0x128   :  { %1149 = vmatprep.mubr.msk.f32.mxu1 %vm114_vm0, %v483_v25  ;;  %1224 = vmatpush3.bf16.msra.mxu1 %v1214_v28 }
 0x129   :  { %1223 = vmatprep.subr.bf16.mxu1 %v1218_v29  ;;  %p1285_p4 = pnand %p1284_p3, %p1278_p0 }
 0x12b   :  { %1150 = vmatmul.mubr.msk.f32.gmra.mrb[2].mxu1 %vm114_vm0, %v490_v11 }
 0x12c   :  { %1225 = vmatpush3.bf16.msra.mxu1 %v1218_v29 }
 0x1fa   :  { %v1148_v31 = vpop.f32.mrb[0].mxu1 }
 0x1fb   :  { %v804_v33 = vadd.f32 %v1148_v31, %v1006_v30  ;;  %v775_v34 = vpop.f32.mrb[1].mxu1 }
 0x1fc   :  { %v803_v35 = vadd.f32 %v1006_v30, %v775_v34 }
 0x1fd   :  { %v808_v36 = vmin.f32 %v804_v33, 20.0  ;;  %vm844_vm12 = vcmp.gt.f32.partialorder %v804_v33, 20.0 }
 0x1fe   :  { %v807_v37 = vmin.f32 %v803_v35, 20.0  ;;  %v1151_v38 = vpop.f32.mrb[2].mxu1  ;;  %vm843_vm11 = vcmp.gt.f32.partialorder %v803_v35, 20.0 }
 0x1ff   :  { %v813_v39 = vmul.f32 1.442695, %v808_v36  ;;  %v806_v40 = vadd.f32 %v1151_v38, %v1006_v30  ;;  %v785_v41 = vpop.f32.mrb[3].mxu1 }
 0x200   :  { %v811_v42 = vmul.f32 1.442695, %v807_v37  ;;  %v805_v43 = vadd.f32 %v1006_v30, %v785_v41 }
 0x201   :  { %1261 = vpow2.f32 %v813_v39  ;;  %v810_v44 = vmin.f32 %v806_v40, 20.0  ;;  %vm846_vm14 = vcmp.gt.f32.partialorder %v806_v40, 20.0 }
 0x202   :  { %1263 = vpow2.f32 %v811_v42  ;;  %v809_v45 = vmin.f32 %v805_v43, 20.0  ;;  %vm845_vm13 = vcmp.gt.f32.partialorder %v805_v43, 20.0 }
 0x203   :  { %v817_v46 = vmul.f32 1.442695, %v810_v44 }
 0x204   :  { %v815_v48 = vmul.f32 1.442695, %v809_v45 }
 0x205   :  { %1265 = vpow2.f32 %v817_v46 }
 0x206   :  { %1267 = vpow2.f32 %v815_v48 }
 0x20b   :  { %v1262_v49 = vpop.eup %1261 }
 0x20c   :  { %v1264_v50 = vpop.eup %1263  ;;  %v820_v51 = vadd.f32 2.0, %v1262_v49 }
 0x20d   :  { %v819_v53 = vadd.f32 2.0, %v1264_v50 }
 0x20e   :  { %v824_v54 = vmul.f32 %v1262_v49, %v820_v51 }
 0x20f   :  { %v1266_v55 = vpop.eup %1265  ;;  %v823_v56 = vmul.f32 %v1264_v50, %v819_v53 }
 0x210   :  { %v1268_v57 = vpop.eup %1267  ;;  %v832_v58 = vadd.f32 2.0, %v824_v54  ;;  %v822_v59 = vadd.f32 2.0, %v1266_v55  ;;  %v828_v3 = vmul.f32 %v824_v54, %v804_v33 }
 0x211   :  { %v831_v60 = vadd.f32 2.0, %v823_v56  ;;  %v821_v61 = vadd.f32 2.0, %v1268_v57  ;;  %v827_v5 = vmul.f32 %v823_v56, %v803_v35 }
 0x212   :  { %1269 = vrcp.f32 %v832_v58  ;;  %v826_v62 = vmul.f32 %v1266_v55, %v822_v59 }
 0x213   :  { %1271 = vrcp.f32 %v831_v60  ;;  %v825_v0 = vmul.f32 %v1268_v57, %v821_v61 }
 0x214   :  { %v834_v1 = vadd.f32 2.0, %v826_v62  ;;  %v830_v13 = vmul.f32 %v826_v62, %v806_v40 }
 0x215   :  { %v833_v2 = vadd.f32 2.0, %v825_v0  ;;  %v829_v63 = vmul.f32 %v825_v0, %v805_v43 }
 0x216   :  { %1273 = vrcp.f32 %v834_v1 }
 0x217   :  { %1275 = vrcp.f32 %v833_v2 }
 0x21c   :  { %v1270_v4 = vpop.eup %1269 }
 0x21d   :  { %v1272_v7 = vpop.eup %1271  ;;  %v838_v8 = vmul.f32 %v1270_v4, %v828_v3 }
 0x21e   :  { %v836_v9 = vmul.f32 %v1272_v7, %v827_v5 }
 0x21f   :  { %v848_v17 = vsel %vm844_vm12, %v804_v33, %v838_v8 }
 0x220   :  { %v1274_v14 = vpop.eup %1273  ;;  %v847_v12 = vsel %vm843_vm11, %v803_v35, %v836_v9 }
 0x221   :  { %v1276_v15 = vpop.eup %1275  ;;  %v842_v16 = vmul.f32 %v1274_v14, %v830_v13  ;;  %1160 = vmatprep.mubr.msk.f32.mxu0 %vm114_vm0, %v847_v12 }
 0x222   :  { %1161 = vmatmul.mubr.msk.f32.vlgmr.msra.gmra.mrb[4].mxu0 %vm114_vm0, %v848_v17  ;;  %v840_v18 = vmul.f32 %v1276_v15, %v829_v63 }
 0x223   :  { %v850_v22 = vsel %vm846_vm14, %v806_v40, %v842_v16 }
 0x224   :  { %v849_v21 = vsel %vm845_vm13, %v805_v43, %v840_v18 }
 0x225   :  { %1163 = vmatprep.mubr.msk.f32.mxu1 %vm114_vm0, %v849_v21 }
 0x226   :  { %1164 = vmatmul.mubr.msk.f32.vlgmr.msra.gmra.mrb[4].mxu1 %vm114_vm0, %v850_v22 }
 0x2f5   :  { %v1162_v25 = vpop.f32.mrb[4].mxu0 }
 0x2f6   :  { %v944_v23 = vadd.f32 %v1162_v25, %v1007_v24  ;;  %v938_v26 = vpop.f32.mrb[5].mxu0 }
 0x2f7   :  { %v939_v11 = vadd.f32 %v1007_v24, %v938_v26 }
 0x2f8   :  { %v958_v32 = vadd.f32 %v944_v23, %v1370_v19 }
 0x2f9   :  { %v957_v27 = vadd.f32 %v939_v11, %v1339_v6  ;;  %v1165_v28 = vpop.f32.mrb[4].mxu1 }
 0x2fa   :  { %962 = vst.msk [vmem:[#allocation2 + $0x8] sm:$0xff] %vm114_vm0, %v958_v32  ;;  %v954_v47 = vadd.f32 %v1165_v28, %v1007_v24  ;;  %v948_v52 = vpop.f32.mrb[5].mxu1 }
 0x2fb   :  { %961 = vst.msk [vmem:[#allocation2] sm:$0xff] %vm114_vm0, %v957_v27  ;;  %v949_v29 = vadd.f32 %v1007_v24, %v948_v52 }
 0x2fc   :  { %v960_v30 = vadd.f32 %v954_v47, %v1352_v10 }
 0x2fd   :  { %v959_v31 = vadd.f32 %v949_v29, %v1375_v20 }
 0x2fe   :  { %964 = vst.msk [vmem:[#allocation2 + $0x18] sm:$0xff] %vm114_vm0, %v960_v30 }
 0x2ff   :  { %963 = vst.msk [vmem:[#allocation2 + $0x10] sm:$0xff] %vm114_vm0, %v959_v31 }
 0x300   :  { %1288 = shalt.err (!%p1285_p4)
}
 0x301   :  { %s1289_s29 = scalar_lea.hbm %s1588_s3, 512 }
 0x302   :  { %p1290_p5 = scmp.ne.s32.totalorder %s1588_s3, %s1289_s29  ;;  %p1293_p6 = scmp.lt.u32.totalorder %s1289_s29, %s1588_s3 }
 0x304   :  { %p1295_p7 = pnand %p1293_p6, %p1290_p5 }
 0x306   :  { %1298 = shalt.err (!%p1295_p7)
}
 0x307   :  { %s1302_s7 = smov 128   ;;  %s1303_s8 = smov 8  }
 0x308   :  { %976 = dma.vmem_to_hbm [thread:$0]  %s971_s26, 512, %s1588_s3, [#allocation3], %s1302_s7, %s1302_s7, %s1303_s8  }
 0x309   :  { %1299 = dma.done.wait [#allocation3], 512  }
 0x30a   :  { %1300 = vsyncadd [#allocation3], 4294966784 }
 0x30b   :  { %980 = vsyncpa [#allocation3], 1 }

</bundles_post_ra>
